<compile_context>
chip_gen: v6e
topology: v6e:2x2x1
jax: 0.10.0
libtpu: 0.0.40
codegen_flags: <defaults>
</compile_context>

<pallas_src>
import functools

import jax
import jax.numpy as jnp
from jax.experimental import pallas as pl
from jax.experimental.pallas import tpu as pltpu

DROPOUT_P = 0.15


# ----------------------------------------------------------------------------
# In-kernel counter-based RNG (plain int32 ops -> lowers on TPU and interpret)
# ----------------------------------------------------------------------------
def _srl32(x, k):
    """Logical right shift for int32 (mask away the sign-extension bits)."""
    return jnp.right_shift(x, k) & jnp.int32((1 << (32 - k)) - 1)


def _fmix32(x):
    """murmur3 finalizer, bit-exact in int32 two's-complement arithmetic."""
    x = x ^ _srl32(x, 16)
    x = x * jnp.int32(-2048144789)        # 0x85ebca6b
    x = x ^ _srl32(x, 13)
    x = x * jnp.int32(-1028477387)        # 0xc2b2ae35
    x = x ^ _srl32(x, 16)
    return x


def _random_bits_i32(seed, layer_idx, shape, row_offset):
    """Per-element pseudo-random int32 bits from (seed, layer, row, col)."""
    r = jax.lax.broadcasted_iota(jnp.int32, shape, 0) + row_offset
    c = jax.lax.broadcasted_iota(jnp.int32, shape, 1)
    h = (r * jnp.int32(-1640531527)                         # 0x9e3779b9
         ^ c * jnp.int32(2135587861)                        # 0x7f4a7c15
         ^ (seed * jnp.int32(1103515245) + jnp.int32(layer_idx * 7919 + 1)))
    return _fmix32(_fmix32(h))


# ----------------------------------------------------------------------------
# Fused MLP kernel: all layers in one pallas_call, intermediates stay in vregs
# ----------------------------------------------------------------------------
def _fused_classifier_kernel(seed_ref, x_ref, *refs,
                             n_layers, p, apply_dropout, block_b):
    o_ref = refs[-1]
    wb = refs[:-1]                      # (w0, b0, w1, b1, ..., w_last, b_last)

    seed = seed_ref[0]                  # single seed, used for all dropout layers
    row0 = pl.program_id(0) * block_b   # global batch offset of this tile
    scale = 1.0 / (1.0 - p)
    # keep element iff its uniform int32 bits >= threshold  (P[keep] = 1 - p)
    thr = jnp.int32(int(round(p * (1 << 32))) - (1 << 31))

    out = x_ref[...]
    for li in range(n_layers):
        w = wb[2 * li][...]
        b = wb[2 * li + 1][...]         # read once per layer (hoisted broadcast)
        # f32 MXU matmul; at these tiny dims bf16 operands buy nothing -- cast
        # x/w to bf16 here (keep preferred_element_type=f32) if dims grow.
        out = jnp.dot(out, w, preferred_element_type=jnp.float32) + b
        if li < n_layers - 1:
            if apply_dropout:
                bits = _random_bits_i32(seed, li, out.shape, row0)
                out = jnp.where(bits >= thr, out * scale, 0.0)
            out = jnp.maximum(out, 0.0)
    o_ref[...] = out.astype(o_ref.dtype)


def classifier_forward(x, params, *, dropout=True, seed=0):
    """Fused Pallas forward pass of Classifier (single pallas_call)."""
    batch, f_in = x.shape
    n_layers = len(params)
    f_out = params[-1][0].shape[1]
    # lane-dense output: pad final feature dim up to a multiple of 128
    f_out_pad = ((f_out + 127) // 128) * 128

    flat = []
    for li, (w, b) in enumerate(params):
        if li == n_layers - 1 and f_out_pad != f_out:
            w = jnp.pad(w, ((0, 0), (0, f_out_pad - f_out)))
            b = jnp.pad(b, ((0, 0), (0, f_out_pad - f_out)))
        flat += [w, b]

    # Batch tiling: one block for small batches, 8-aligned tiles otherwise.
    block_b = batch if batch <= 512 else 512
    grid = (pl.cdiv(batch, block_b),)

    kernel = functools.partial(
        _fused_classifier_kernel,
        n_layers=n_layers, p=DROPOUT_P, apply_dropout=dropout, block_b=block_b)

    in_specs = [pl.BlockSpec((block_b, f_in), lambda i, s: (i, 0))]
    for arr in flat:   # weights/biases: whole array resident, constant block
        in_specs.append(pl.BlockSpec(arr.shape, lambda i, s: (0, 0)))
    out_spec = pl.BlockSpec((block_b, f_out_pad), lambda i, s: (i, 0))

    out = pl.pallas_call(
        kernel,
        out_shape=jax.ShapeDtypeStruct((batch, f_out_pad), jnp.float32),
        grid_spec=pltpu.PrefetchScalarGridSpec(
            num_scalar_prefetch=1,        # seed -> SMEM
            grid=grid,
            in_specs=in_specs,
            out_specs=out_spec),
        compiler_params=pltpu.CompilerParams(
            dimension_semantics=("parallel",)),   # shard batch across TCs (v7x)
    )(jnp.asarray([seed], dtype=jnp.int32), x, *flat)

    return out[:, :f_out] if f_out_pad != f_out else out


# ----------------------------------------------------------------------------
# Init + pure-JAX reference
# ----------------------------------------------------------------------------
def init_classifier_params(key, layer_config):
    """Deterministic init mimicking nn.Linear default (U[-1/sqrt(fan_in), +])."""
    params = []
    for i in range(len(layer_config) - 1):
        fan_in, fan_out = layer_config[i], layer_config[i + 1]
        key, kw, kb = jax.random.split(key, 3)
        bound = 1.0 / jnp.sqrt(fan_in)
        w = jax.random.uniform(kw, (fan_in, fan_out), jnp.float32, -bound, bound)
        b = jax.random.uniform(kb, (1, fan_out), jnp.float32, -bound, bound)
        params.append((w, b))
    return params


def classifier_forward_ref(x, params):
    """Pure-JAX reference (dropout disabled)."""
    hp = jax.lax.Precision.HIGHEST
    out = x
    for w, b in params[:-1]:
        out = jnp.maximum(jnp.dot(out, w, precision=hp) + b, 0.0)
    w, b = params[-1]
    return jnp.dot(out, w, precision=hp) + b


if __name__ == "__main__":
    # config['layers'] = [64, 32, 32, 10] -> two hidden linears + final linear
    layer_config = [64, 32, 32, 10]
    batch = 8

    key = jax.random.PRNGKey(0)
    key, kx = jax.random.split(key)
    x = jax.random.normal(kx, (batch, layer_config[0]), jnp.float32)
    params = init_classifier_params(key, layer_config)

    # Deterministic path (dropout=False): must match the pure-JAX reference.
    out_no_do = classifier_forward(x, params, dropout=False)
    out_no_do = jax.block_until_ready(out_no_do)
    ref = classifier_forward_ref(x, params)
    assert out_no_do.shape == (batch, layer_config[-1])
    assert jnp.allclose(out_no_do, ref, atol=1e-4, rtol=1e-4), "mismatch vs reference"

    # Training-style path (dropout=True) exercising the in-kernel mask RNG.
    out_do = classifier_forward(x, params, dropout=True, seed=123)
    out_do = jax.block_until_ready(out_do)
    assert out_do.shape == (batch, layer_config[-1])
    assert jnp.all(jnp.isfinite(out_do))

    print("KERNEL_OK")
</pallas_src>

<mosaic_0001>
module attributes {stable_mosaic.version = 11 : i64} {
  func.func @_fused_classifier_kernel(%arg0: i32, %arg1: memref<1xi32, #tpu.memory_space<smem>>, %arg2: memref<8x64xf32, #tpu.memory_space<vmem>>, %arg3: memref<64x32xf32, #tpu.memory_space<vmem>>, %arg4: memref<1x32xf32, #tpu.memory_space<vmem>>, %arg5: memref<32x32xf32, #tpu.memory_space<vmem>>, %arg6: memref<1x32xf32, #tpu.memory_space<vmem>>, %arg7: memref<32x128xf32, #tpu.memory_space<vmem>>, %arg8: memref<1x128xf32, #tpu.memory_space<vmem>>, %arg9: memref<8x128xf32, #tpu.memory_space<vmem>>) attributes {dimension_semantics = [#tpu.dimension_semantics<parallel>], iteration_bounds = array<i64: 1>, scalar_prefetch = 1 : i64, scratch_operands = 0 : i64, tpu.core_type = #tpu.core_type<tc>, window_params = [{transform_indices = @transform_0, window_bounds = array<i64: 8, 64>}, {pipeline_mode = #tpu.pipeline_mode<synchronous>, transform_indices = @transform_1, window_bounds = array<i64: 64, 32>}, {pipeline_mode = #tpu.pipeline_mode<synchronous>, transform_indices = @transform_2, window_bounds = array<i64: 1, 32>}, {pipeline_mode = #tpu.pipeline_mode<synchronous>, transform_indices = @transform_3, window_bounds = array<i64: 32, 32>}, {pipeline_mode = #tpu.pipeline_mode<synchronous>, transform_indices = @transform_4, window_bounds = array<i64: 1, 32>}, {pipeline_mode = #tpu.pipeline_mode<synchronous>, transform_indices = @transform_5, window_bounds = array<i64: 32, 128>}, {pipeline_mode = #tpu.pipeline_mode<synchronous>, transform_indices = @transform_6, window_bounds = array<i64: 1, 128>}, {transform_indices = @transform_7, window_bounds = array<i64: 8, 128>}]} {
    %c0 = arith.constant 0 : index
    %c0_0 = arith.constant 0 : index
    %0 = vector.load %arg2[%c0, %c0_0] : memref<8x64xf32, #tpu.memory_space<vmem>>, vector<8x64xf32>
    %c0_1 = arith.constant 0 : index
    %c0_2 = arith.constant 0 : index
    %1 = vector.load %arg3[%c0_1, %c0_2] : memref<64x32xf32, #tpu.memory_space<vmem>>, vector<64x32xf32>
    %c0_3 = arith.constant 0 : index
    %c0_4 = arith.constant 0 : index
    %2 = vector.load %arg4[%c0_3, %c0_4] : memref<1x32xf32, #tpu.memory_space<vmem>>, vector<1x32xf32>
    %cst = arith.constant dense<0.000000e+00> : vector<8x32xf32>
    %3 = tpu.matmul %0, %1, %cst {dimension_numbers = #tpu.dot_dimension_numbers<[1], [0], [0], [1], [0, 0, 1, 1], [], []>} : vector<8x64xf32>, vector<64x32xf32>, vector<8x32xf32> -> vector<8x32xf32>
    %4 = vector.broadcast %2 : vector<1x32xf32> to vector<8x32xf32>
    %5 = arith.addf %3, %4 : vector<8x32xf32>
    %cst_5 = arith.constant 0.000000e+00 : f32
    %6 = vector.broadcast %cst_5 : f32 to vector<8x32xf32>
    %7 = arith.maximumf %5, %6 : vector<8x32xf32>
    %c0_6 = arith.constant 0 : index
    %c0_7 = arith.constant 0 : index
    %8 = vector.load %arg5[%c0_6, %c0_7] : memref<32x32xf32, #tpu.memory_space<vmem>>, vector<32x32xf32>
    %c0_8 = arith.constant 0 : index
    %c0_9 = arith.constant 0 : index
    %9 = vector.load %arg6[%c0_8, %c0_9] : memref<1x32xf32, #tpu.memory_space<vmem>>, vector<1x32xf32>
    %cst_10 = arith.constant dense<0.000000e+00> : vector<8x32xf32>
    %10 = tpu.matmul %7, %8, %cst_10 {dimension_numbers = #tpu.dot_dimension_numbers<[1], [0], [0], [1], [0, 0, 1, 1], [], []>} : vector<8x32xf32>, vector<32x32xf32>, vector<8x32xf32> -> vector<8x32xf32>
    %11 = vector.broadcast %9 : vector<1x32xf32> to vector<8x32xf32>
    %12 = arith.addf %10, %11 : vector<8x32xf32>
    %cst_11 = arith.constant 0.000000e+00 : f32
    %13 = vector.broadcast %cst_11 : f32 to vector<8x32xf32>
    %14 = arith.maximumf %12, %13 : vector<8x32xf32>
    %c0_12 = arith.constant 0 : index
    %c0_13 = arith.constant 0 : index
    %15 = vector.load %arg7[%c0_12, %c0_13] : memref<32x128xf32, #tpu.memory_space<vmem>>, vector<32x128xf32>
    %c0_14 = arith.constant 0 : index
    %c0_15 = arith.constant 0 : index
    %16 = vector.load %arg8[%c0_14, %c0_15] : memref<1x128xf32, #tpu.memory_space<vmem>>, vector<1x128xf32>
    %cst_16 = arith.constant dense<0.000000e+00> : vector<8x128xf32>
    %17 = tpu.matmul %14, %15, %cst_16 {dimension_numbers = #tpu.dot_dimension_numbers<[1], [0], [0], [1], [0, 0, 1, 1], [], []>} : vector<8x32xf32>, vector<32x128xf32>, vector<8x128xf32> -> vector<8x128xf32>
    %18 = vector.broadcast %16 : vector<1x128xf32> to vector<8x128xf32>
    %19 = arith.addf %17, %18 : vector<8x128xf32>
    %c0_17 = arith.constant 0 : index
    %c0_18 = arith.constant 0 : index
    %20 = vector.load %arg9[%c0_17, %c0_18] : memref<8x128xf32, #tpu.memory_space<vmem>>, vector<8x128xf32>
    tpu.vector_store %arg9[%c0_17, %c0_18], %19 {strides = array<i32>} : memref<8x128xf32, #tpu.memory_space<vmem>>, vector<8x128xf32>,
    return
  }
  func.func @transform_0(%arg0: i32, %arg1: memref<1xi32, #tpu.memory_space<smem>>) -> (i32, i32) {
    %c0_i32 = arith.constant 0 : i32
    %c0_i32_0 = arith.constant 0 : i32
    return %arg0, %c0_i32 : i32, i32
  }
  func.func @transform_1(%arg0: i32, %arg1: memref<1xi32, #tpu.memory_space<smem>>) -> (i32, i32) {
    %c0_i32 = arith.constant 0 : i32
    %c0_i32_0 = arith.constant 0 : i32
    %c0_i32_1 = arith.constant 0 : i32
    return %c0_i32, %c0_i32_0 : i32, i32
  }
  func.func @transform_2(%arg0: i32, %arg1: memref<1xi32, #tpu.memory_space<smem>>) -> (i32, i32) {
    %c0_i32 = arith.constant 0 : i32
    %c0_i32_0 = arith.constant 0 : i32
    %c0_i32_1 = arith.constant 0 : i32
    return %c0_i32, %c0_i32_0 : i32, i32
  }
  func.func @transform_3(%arg0: i32, %arg1: memref<1xi32, #tpu.memory_space<smem>>) -> (i32, i32) {
    %c0_i32 = arith.constant 0 : i32
    %c0_i32_0 = arith.constant 0 : i32
    %c0_i32_1 = arith.constant 0 : i32
    return %c0_i32, %c0_i32_0 : i32, i32
  }
  func.func @transform_4(%arg0: i32, %arg1: memref<1xi32, #tpu.memory_space<smem>>) -> (i32, i32) {
    %c0_i32 = arith.constant 0 : i32
    %c0_i32_0 = arith.constant 0 : i32
    %c0_i32_1 = arith.constant 0 : i32
    return %c0_i32, %c0_i32_0 : i32, i32
  }
  func.func @transform_5(%arg0: i32, %arg1: memref<1xi32, #tpu.memory_space<smem>>) -> (i32, i32) {
    %c0_i32 = arith.constant 0 : i32
    %c0_i32_0 = arith.constant 0 : i32
    %c0_i32_1 = arith.constant 0 : i32
    return %c0_i32, %c0_i32_0 : i32, i32
  }
  func.func @transform_6(%arg0: i32, %arg1: memref<1xi32, #tpu.memory_space<smem>>) -> (i32, i32) {
    %c0_i32 = arith.constant 0 : i32
    %c0_i32_0 = arith.constant 0 : i32
    %c0_i32_1 = arith.constant 0 : i32
    return %c0_i32, %c0_i32_0 : i32, i32
  }
  func.func @transform_7(%arg0: i32, %arg1: memref<1xi32, #tpu.memory_space<smem>>) -> (i32, i32) {
    %c0_i32 = arith.constant 0 : i32
    %c0_i32_0 = arith.constant 0 : i32
    return %arg0, %c0_i32 : i32, i32
  }
}

</mosaic_0001>

<bundles_post_ra>
// kernel: tpu_custom_call.1
= control target key start
LH: loop header
LB: loop body
LE: loop exit
PB: predicated region body
PF: predicated region fallthrough
CT: control target
= control target key end

     0   :  { %v396_v1 = vmov 0.0   ;;  %vm397_vm0 = vmmov 0   ;;  %s512_s0 = inlined_call_operand.<no memory space> [shape: s32[1], index: 0, kind: input, shape index: {}]   ;;  %s513_s1 = inlined_call_operand.vmem [shape: f32[8,64], index: 1, kind: input, shape index: {}]   ;;  %s514_s2 = inlined_call_operand.vmem [shape: f32[64,32], index: 2, kind: input, shape index: {}]   ;;  %s515_s3 = inlined_call_operand.vmem [shape: f32[1,32], index: 3, kind: input, shape index: {}]   ;;  %s516_s4 = inlined_call_operand.vmem [shape: f32[32,32], index: 4, kind: input, shape index: {}]   ;;  %s517_s5 = inlined_call_operand.vmem [shape: f32[1,32], index: 5, kind: input, shape index: {}]   ;;  %s518_s6 = inlined_call_operand.vmem [shape: f32[32,128], index: 6, kind: input, shape index: {}]   ;;  %s519_s7 = inlined_call_operand.vmem [shape: f32[1,128], index: 7, kind: input, shape index: {}]   ;;  %s520_s8 = inlined_call_operand.hbm [shape: f32[8,128], index: 8, kind: output, shape index: {}]  }
   0x1   :  { %v37_v0 = vld [vmem:[%s514_s2 + $0x38] sm:$0xff]  ;;  %330 = vmatprep.subr.mxu0 %v396_v1  ;;  %v36_v2 = vld [vmem:[%s514_s2 + $0x30] sm:$0xff]  ;;  %346 = vmatprep.mubr.msk.f32.mxu0 %vm397_vm0, %v396_v1  ;;  %v35_v3 = vld [vmem:[%s514_s2 + $0x28] sm:$0xff] }
   0x2   :  { %331 = vmatpush3.msra.mxu0 %v37_v0  ;;  %349 = vmatprep.subr.mxu1 %v396_v1  ;;  %v123_v4 = vld [vmem:[%s516_s4 + $0x18] sm:$0xff] }
   0x3   :  { %332 = vmatprep.subr.mxu0 %v396_v1  ;;  %357 = vmatprep.mubr.msk.f32.mxu1 %vm397_vm0, %v396_v1 }
   0x4   :  { %14 = vsyncpa [#allocation5], 0  ;;  %333 = vmatpush3.msra.mxu0 %v36_v2  ;;  %350 = vmatpush3.msra.mxu1 %v123_v4  ;;  %v34_v5 = vld [vmem:[%s514_s2 + $0x20] sm:$0xff]  ;;  %v33_v6 = vld [vmem:[%s514_s2 + $0x18] sm:$0xff]  ;;  %vm45_vm1 = vcmask 523264   ;;  %vm131_vm2 = vcmask 261120  }
   0x5   :  { %334 = vmatprep.subr.mxu0 %v396_v1  ;;  %351 = vmatprep.subr.mxu1 %v396_v1  ;;  %v32_v7 = vld [vmem:[%s514_s2 + $0x10] sm:$0xff]  ;;  %v31_v8 = vld [vmem:[%s514_s2 + $0x8] sm:$0xff]  ;;  %v30_v9 = vld [vmem:[%s514_s2] sm:$0xff]  ;;  %s398_s17 = smov [#allocation4]  }
   0x6   :  { %335 = vmatpush3.msra.mxu0 %v35_v3  ;;  %v29_v10 = vld [vmem:[%s513_s1] sm:$0xff]  ;;  %v122_v11 = vld [vmem:[%s516_s4 + $0x10] sm:$0xff]  ;;  %v121_v12 = vld [vmem:[%s516_s4 + $0x8] sm:$0xff]  ;;  %s297_s18 = sshll.u32 %s398_s17, 4  ;;  %s298_s18 = int_to_ptr.vmem [resolvable:$true] %s297_s18 }
   0x7   :  { %336 = vmatprep.subr.mxu0 %v396_v1  ;;  %352 = vmatpush3.msra.mxu1 %v122_v11  ;;  %v120_v13 = vld [vmem:[%s516_s4] sm:$0xff]  ;;  %v209_v19 = vld [vmem:[%s518_s6 + $0x18] sm:$0xff]  ;;  %v208_v20 = vld [vmem:[%s518_s6 + $0x10] sm:$0xff]  ;;  %p379_p1 = scmp.lt.s32.totalorder %s298_s18, %s298_s18 }
   0x8   :  { %337 = vmatpush3.msra.mxu0 %v34_v5  ;;  %353 = vmatprep.subr.mxu1 %v396_v1  ;;  %v305_v14 = vld [vmem:[%s515_s3] ss:$0 sm:$0xff]  ;;  %v207_v21 = vld [vmem:[%s518_s6 + $0x8] sm:$0xff] }
   0x9   :  { %338 = vmatprep.subr.mxu0 %v396_v1  ;;  %354 = vmatpush3.msra.mxu1 %v121_v12  ;;  %v206_v22 = vld [vmem:[%s518_s6] sm:$0xff]  ;;  %s374_s6 = scalar_lea.vmem %s298_s18, 128 }
   0xa   :  { %339 = vmatpush3.msra.mxu0 %v33_v6  ;;  %355 = vmatprep.subr.mxu1 %v396_v1  ;;  %v307_v23 = vld [vmem:[%s517_s5] ss:$0 sm:$0xff]  ;;  %p375_p0 = scmp.ne.s32.totalorder %s298_s18, %s374_s6  ;;  %p380_p2 = scmp.lt.s32.totalorder %s374_s6, %s374_s6 }
   0xb   :  { %340 = vmatprep.subr.mxu0 %v396_v1  ;;  %356 = vmatpush3.msra.mxu1 %v120_v13  ;;  %v309_v28 = vld [vmem:[%s519_s7] ss:$0 sm:$0xff] }
   0xc   :  { %341 = vmatpush3.msra.mxu0 %v32_v7  ;;  %360 = vmatprep.subr.mxu1 %v396_v1  ;;  %p381_p3 = por %p380_p2, %p379_p1 }
   0xd   :  { %342 = vmatprep.subr.mxu0 %v396_v1 }
   0xe   :  { %343 = vmatpush3.msra.mxu0 %v31_v8  ;;  %p382_p4 = pnand %p381_p3, %p375_p0 }
   0xf   :  { %344 = vmatprep.subr.mxu0 %v396_v1 }
  0x10   :  { %345 = vmatpush3.msra.mxu0 %v30_v9 }
  0x11   :  { %347 = vmatmul.mubr.msk.f32.vlgmr.msra.gmra.mxu0 %vm45_vm1, %v29_v10 }
  0xd1   :  { %v115_v15 = vpop.f32.mrf.mxu0 }
  0xd2   :  { %v116_v16 = vadd.f32 %v305_v14, %v115_v15 }
  0xd3   :  { %v348_v17 = vpop.f32.mrf.mxu0 }
  0xd4   :  { %v119_v18 = vmax.f32 %v116_v16, 0.0 }
  0xd6   :  { %358 = vmatmul.mubr.msk.f32.vlgmr.msra.gmra.mxu1 %vm131_vm2, %v119_v18 }
  0xd7   :  { %361 = vmatpush3.msra.mxu1 %v209_v19  ;;  %368 = vmatprep.mubr.msk.f32.mxu1 %vm397_vm0, %v396_v1 }
  0xd8   :  { %362 = vmatprep.subr.mxu1 %v396_v1 }
  0xd9   :  { %363 = vmatpush3.msra.mxu1 %v208_v20 }
  0xda   :  { %364 = vmatprep.subr.mxu1 %v396_v1 }
  0xdb   :  { %365 = vmatpush3.msra.mxu1 %v207_v21 }
  0xdc   :  { %366 = vmatprep.subr.mxu1 %v396_v1 }
  0xdd   :  { %367 = vmatpush3.msra.mxu1 %v206_v22 }
 0x196   :  { %v201_v24 = vpop.f32.mrf.mxu1 }
 0x197   :  { %v202_v25 = vadd.f32 %v307_v23, %v201_v24 }
 0x198   :  { %v359_v26 = vpop.f32.mrf.mxu1 }
 0x199   :  { %v205_v27 = vmax.f32 %v202_v25, 0.0 }
 0x19b   :  { %369 = vmatmul.mubr.msk.f32.vlgmr.msra.gmra.mxu1 %vm131_vm2, %v205_v27 }
 0x25b   :  { %v286_v29 = vpop.f32.mrf.mxu1 }
 0x25c   :  { %v287_v30 = vadd.f32 %v309_v28, %v286_v29 }
 0x25d   :  { %v370_v31 = vpop.f32.mrf.mxu1 }
 0x25e   :  { %290 = vst [vmem:[#allocation4] sm:$0xff] %v287_v30 }
 0x25f   :  { %385 = shalt.err (!%p382_p4)
}
 0x260   :  { %300 = dma.vmem_to_hbm [thread:$0]  %s298_s18, 128, %s520_s8, [#allocation5]  }
 0x261   :  { %394 = dma.done.wait [#allocation5], 128  }
 0x262   :  { %395 = vsyncadd [#allocation5], 4294967168 }
 0x263   :  { %304 = vsyncpa [#allocation5], 1 }

</bundles_post_ra>
